<compile_context>
chip_gen: v5e
topology: v5e:2x2
jax: 0.10.0
libtpu: 0.0.40
codegen_flags: <defaults>
</compile_context>

<pallas_src>
import functools

import jax
import jax.numpy as jnp
from jax.experimental import pallas as pl
from jax.experimental.pallas import tpu as pltpu

IN_FEATURES = 8
OUT_FEATURES = 8


def linear_clamp_kernel(x_ref, wb_ref, o_ref, *, min_value, max_value):
    # x_ref : (B, IN)        full-array VMEM block
    # wb_ref: (IN + 1, OUT)  packed parameters: rows [0:IN] = W^T, row [IN] = b
    # min_value / max_value are compile-time immediates (VPU max/min with
    # immediate operands), not memory operands.
    w = wb_ref[0:IN_FEATURES, :]                       # (IN, OUT)  static slice
    b = wb_ref[IN_FEATURES:IN_FEATURES + 1, :]         # (1, OUT)   static slice
    y = jnp.dot(x_ref[...], w, preferred_element_type=jnp.float32)
    y = y + b
    y = jnp.maximum(y, min_value)   # clamp_min
    y = jnp.minimum(y, max_value)   # clamp_max
    o_ref[...] = y.astype(o_ref.dtype)


def init_params(key, in_features=IN_FEATURES, out_features=OUT_FEATURES):
    """PyTorch-default-like uniform init.

    Parameters are stored as ONE packed (in_features + 1, out_features) array:
      rows [0 : in]  -> W^T  (so the kernel computes x @ W^T + b directly)
      row  [in]      -> bias
    so the forward wrapper does zero layout work and issues a single param DMA.
    """
    kw, kb = jax.random.split(key)
    bound = 1.0 / (in_features ** 0.5)
    w = jax.random.uniform(kw, (out_features, in_features),
                           minval=-bound, maxval=bound, dtype=jnp.float32)
    b = jax.random.uniform(kb, (out_features,),
                           minval=-bound, maxval=bound, dtype=jnp.float32)
    wb = jnp.concatenate([w.T, b.reshape(1, out_features)], axis=0)  # (IN+1, OUT)
    return {"wb": wb}


def make_linear_clamp(min_value=0.0, max_value=0.9):
    kernel = functools.partial(
        linear_clamp_kernel,
        min_value=float(min_value),
        max_value=float(max_value),
    )

    @jax.jit
    def fwd(x, wb):
        B = x.shape[0]
        OUT = wb.shape[1]
        # Gridless call: each operand is one full-array VMEM block; whole
        # Linear + clamp_min + clamp_max stays fused in a single pallas_call.
        #
        # NOTE (future batched path): if B ever grows, do NOT tile (B, 8) —
        # transpose the problem so batch lands on the lane axis (compute
        # Y^T (OUT, B) with B tiled in multiples of 128) for lane-dense,
        # unmasked stores; add a grid over batch tiles marked "parallel"
        # (sharded across v7x's two TensorCores); size tiles against 64 MiB
        # VMEM on v7x, and on v6e raise block rows toward 512-1024 with
        # pltpu.CompilerParams(vmem_limit_bytes=...) instead of the 32 MiB
        # scoped default.  At B=1 all of that is pure overhead.
        return pl.pallas_call(
            kernel,
            out_shape=jax.ShapeDtypeStruct((B, OUT), x.dtype),
            in_specs=[
                pl.BlockSpec(memory_space=pltpu.MemorySpace.VMEM),   # x
                pl.BlockSpec(memory_space=pltpu.MemorySpace.VMEM),   # packed W^T|b
            ],
            out_specs=pl.BlockSpec(memory_space=pltpu.MemorySpace.VMEM),
        )(x, wb)

    return fwd


if __name__ == "__main__":
    key = jax.random.PRNGKey(0)
    kx, kp = jax.random.split(key)

    # Module shapes: Linear(8, 8); input x1 = randn(1, 8)
    x1 = jax.random.normal(kx, (1, IN_FEATURES), dtype=jnp.float32)
    params = init_params(kp)

    linear_clamp = make_linear_clamp(min_value=0.0, max_value=0.9)
    out = linear_clamp(x1, params["wb"])
    out = jax.block_until_ready(out)

    # Reference check in plain JAX (unpack the packed params the same way).
    w_t = params["wb"][:IN_FEATURES, :]
    b = params["wb"][IN_FEATURES:, :]
    ref = jnp.clip(x1 @ w_t + b, 0.0, 0.9)

    assert out.shape == (1, OUT_FEATURES)
    assert jnp.allclose(out, ref, atol=1e-5), (out, ref)

    print("KERNEL_OK")
</pallas_src>

<mosaic_0001>
module attributes {stable_mosaic.version = 11 : i64} {
  func.func @linear_clamp_kernel(%arg0: memref<1x8xf32, #tpu.memory_space<vmem>>, %arg1: memref<9x8xf32, #tpu.memory_space<vmem>>, %arg2: memref<1x8xf32, #tpu.memory_space<vmem>>) attributes {dimension_semantics = [], scalar_prefetch = 0 : i64, scratch_operands = 0 : i64, tpu.core_type = #tpu.core_type<tc>} {
    %c0 = arith.constant 0 : index
    %c0_0 = arith.constant 0 : index
    %0 = vector.load %arg1[%c0, %c0_0] : memref<9x8xf32, #tpu.memory_space<vmem>>, vector<8x8xf32>
    %c8 = arith.constant 8 : index
    %c0_1 = arith.constant 0 : index
    %1 = vector.load %arg1[%c8, %c0_1] : memref<9x8xf32, #tpu.memory_space<vmem>>, vector<1x8xf32>
    %c0_2 = arith.constant 0 : index
    %c0_3 = arith.constant 0 : index
    %2 = vector.load %arg0[%c0_2, %c0_3] : memref<1x8xf32, #tpu.memory_space<vmem>>, vector<1x8xf32>
    %cst = arith.constant dense<0.000000e+00> : vector<1x8xf32>
    %3 = tpu.matmul %2, %0, %cst {dimension_numbers = #tpu.dot_dimension_numbers<[1], [0], [0], [1], [0, 0, 1, 1], [], []>} : vector<1x8xf32>, vector<8x8xf32>, vector<1x8xf32> -> vector<1x8xf32>
    %4 = arith.addf %3, %1 : vector<1x8xf32>
    %cst_4 = arith.constant 0.000000e+00 : f32
    %5 = vector.broadcast %cst_4 : f32 to vector<1x8xf32>
    %6 = arith.maximumf %4, %5 : vector<1x8xf32>
    %cst_5 = arith.constant 0.899999976 : f32
    %7 = vector.broadcast %cst_5 : f32 to vector<1x8xf32>
    %8 = arith.minimumf %6, %7 : vector<1x8xf32>
    %c0_6 = arith.constant 0 : index
    %c0_7 = arith.constant 0 : index
    %9 = vector.load %arg2[%c0_6, %c0_7] : memref<1x8xf32, #tpu.memory_space<vmem>>, vector<1x8xf32>
    tpu.vector_store %arg2[%c0_6, %c0_7], %8 {strides = array<i32>} : memref<1x8xf32, #tpu.memory_space<vmem>>, vector<1x8xf32>,
    return
  }
}

</mosaic_0001>

<bundles_post_ra>
// kernel: fwd.1
= control target key start
LH: loop header
LB: loop body
LE: loop exit
PB: predicated region body
PF: predicated region fallthrough
CT: control target
= control target key end

     0   :  { %vm15_vm0 = vcmask 64512   ;;  %s115_s0 = inlined_call_operand.vmem [shape: f32[1,8], index: 0, kind: input, shape index: {}]   ;;  %s116_s1 = inlined_call_operand.vmem [shape: f32[9,8], index: 1, kind: input, shape index: {}]   ;;  %s117_s2 = inlined_call_operand.hbm [shape: f32[1,8], index: 2, kind: output, shape index: {}]  }
   0x1   :  { %v12_v0 = vld [vmem:[%s116_s1] sm:$0xff] }
   0x2   :  { %v14_v1 = vld [vmem:[%s115_s0] sm:$0x1]  ;;  %34 = vmatpush.msra.mxu0 %v12_v0 }
   0x3   :  { %7 = vsyncpa [#allocation3], 0  ;;  %59 = vmatmul.msk.f32.vlgmr.msra.gmra.mxu0 %vm15_vm0, %v14_v1  ;;  %v13_v2 = vld [vmem:[%s116_s1 + $0x8] sm:$0x1]  ;;  %s87_s15 = smov [#allocation2]   ;;  %s50_s19 = sshll.u32 %s117_s2, 4  ;;  %s51_s19 = int_to_ptr.hbm [resolvable:$true] %s50_s19 }
   0x4   :  { %s48_s16 = sshll.u32 %s87_s15, 4  ;;  %vm41_vm1 = vcmask 57344   ;;  %s49_s16 = int_to_ptr.vmem [resolvable:$true] %s48_s16 }
  0x80   :  { %v36_v3 = vpop.f32.mrf.mxu0 }
  0x81   :  { %v37_v4 = vadd.f32 %v36_v3, %v13_v2 }
  0x83   :  { %v39_v5 = vmax.f32 %v37_v4, 0.0 }
  0x85   :  { %v40_v6 = vmin.f32 %v39_v5, 0.9 }
  0x87   :  { %42 = vst.msk [vmem:[#allocation2] sm:$0x1] %vm41_vm1, %v40_v6 }
  0x88   :  { %53 = dma.vmem_to_hbm [thread:$0]  %s49_s16, 16, %s51_s19, [#allocation3]  }
  0x89   :  { %85 = dma.done.wait [#allocation3], 16  }
  0x8a   :  { %86 = vsyncadd [#allocation3], 4294967280 }
  0x8b   :  { %58 = vsyncpa [#allocation3], 1 }

</bundles_post_ra>
